<compile_context>
chip_gen: v6e
topology: v6e:2x2x1
jax: 0.10.0
libtpu: 0.0.40
codegen_flags: <defaults>
</compile_context>

<pallas_src>
import math
import functools

import jax
import jax.numpy as jnp
from jax import lax
from jax.experimental import pallas as pl
from jax.experimental.pallas import tpu as pltpu  # noqa: F401  (no TPU-specific params needed at this size)

# ---------------- config (small, consistent with the module) ----------------
B = 2            # batch
S = 8            # sequence length (n_patches)
HIDDEN = 32      # config.hidden_size
NUM_HEADS = 4    # config.transformer['num_heads']
HEAD_DIM = HIDDEN // NUM_HEADS
VIS = True
# TODO(synk): attn_dropout / proj_dropout are identity here (eval-mode semantics).


def _attention_kernel(x_ref, wqkv_ref, bqkv_ref, wo_ref, bo_ref, out_ref,
                      *maybe_attn_ref, batch, seq, num_heads, head_dim):
    """Whole (tiny) problem in one invocation: fused QKV projection + per-(batch, head)
    attention + output projection. Weights arrive pre-fused / pre-transposed from the
    wrapper, so there are no in-kernel weight transposes and no 3-D relayouts."""
    attn_ref = maybe_attn_ref[0] if maybe_attn_ref else None
    hidden = num_heads * head_dim
    scale = 1.0 / math.sqrt(head_dim)

    x = x_ref[...]                                               # [B*S, H]
    # One fused matmul: [B*S, H] @ [H, 3H] + [1, 3H]  -> columns are [Q | K | V].
    qkv = jnp.dot(x, wqkv_ref[...],
                  preferred_element_type=jnp.float32) + bqkv_ref[...]

    wo_t = wo_ref[...]                                           # [H, H], pre-transposed
    bo = bo_ref[...]                                             # [1, H]

    for b in range(batch):                                       # static -> fully unrolled
        r0 = b * seq
        acc = jnp.zeros((seq, hidden), jnp.float32)
        for h in range(num_heads):                               # static -> fully unrolled
            c = h * head_dim
            q = qkv[r0:r0 + seq, c:c + head_dim]                              # [S, hd]
            k = qkv[r0:r0 + seq, hidden + c:hidden + c + head_dim]            # [S, hd]
            v = qkv[r0:r0 + seq, 2 * hidden + c:2 * hidden + c + head_dim]    # [S, hd]

            # q @ k.T without materializing a transpose (NT dot_general).
            s = lax.dot_general(q, k, (((1,), (1,)), ((), ())),
                                preferred_element_type=jnp.float32) * scale   # [S, S]

            # Numerically stable softmax; reciprocal goes to the EUP slot,
            # one Newton step restores full f32 accuracy for ~free.
            m = jnp.max(s, axis=-1, keepdims=True)
            e = jnp.exp(s - m)
            denom = jnp.sum(e, axis=-1, keepdims=True)
            inv = pl.reciprocal(denom, approx=True)
            inv = inv * (2.0 - denom * inv)
            p = e * inv                                                       # [S, S]

            if attn_ref is not None:
                attn_ref[b * num_heads + h] = p.astype(attn_ref.dtype)

            ctx = jnp.dot(p, v, preferred_element_type=jnp.float32)           # [S, hd]
            # Output projection folded per head:
            #   ctx_full @ wo.T == sum_h ctx_h @ wo_t[h*hd:(h+1)*hd, :]
            acc = acc + jnp.dot(ctx, wo_t[c:c + head_dim, :],
                                preferred_element_type=jnp.float32)

        out_ref[r0:r0 + seq, :] = (acc + bo).astype(out_ref.dtype)


def attention_forward(x, params, *, num_heads=NUM_HEADS, vis=VIS):
    """x: [B, S, H] float32. params: dict of torch-convention Linear weights/biases."""
    b, s, h = x.shape
    hd = h // num_heads

    # Wrapper-side parameter packing (one-time in a real model):
    # fuse QKV into one pre-transposed [H, 3H] matrix, pre-transpose wo, 2-D biases.
    wqkv_t = jnp.concatenate([params['wq'], params['wk'], params['wv']], axis=0).T  # [H, 3H]
    bqkv = jnp.concatenate([params['bq'], params['bk'], params['bv']]).reshape(1, 3 * h)
    wo_t = params['wo'].T                                                           # [H, H]
    bo = params['bo'].reshape(1, h)

    x2d = x.reshape(b * s, h)          # collapse the batch grid: single kernel invocation

    kernel = functools.partial(_attention_kernel, batch=b, seq=s,
                               num_heads=num_heads, head_dim=hd)

    if vis:
        out2d, attn_flat = pl.pallas_call(
            kernel,
            out_shape=(
                jax.ShapeDtypeStruct((b * s, h), x.dtype),
                jax.ShapeDtypeStruct((b * num_heads, s, s), jnp.float32),
            ),
        )(x2d, wqkv_t, bqkv, wo_t, bo)
        weights = attn_flat.reshape(b, num_heads, s, s)
    else:
        # vis=False: probs are never written to HBM (no attn output stream at all).
        out2d = pl.pallas_call(
            kernel,
            out_shape=jax.ShapeDtypeStruct((b * s, h), x.dtype),
        )(x2d, wqkv_t, bqkv, wo_t, bo)
        weights = None

    return out2d.reshape(b, s, h), weights


def _reference(x, params, num_heads):
    """Pure-JAX reference (mirrors the PyTorch module)."""
    b, s, h = x.shape
    hd = h // num_heads
    q = x @ params['wq'].T + params['bq']
    k = x @ params['wk'].T + params['bk']
    v = x @ params['wv'].T + params['bv']

    def split(t):
        return t.reshape(b, s, num_heads, hd).transpose(0, 2, 1, 3)

    q, k, v = split(q), split(k), split(v)
    scores = jnp.einsum('bhqd,bhkd->bhqk', q, k) / math.sqrt(hd)
    probs = jax.nn.softmax(scores, axis=-1)
    ctx = jnp.einsum('bhqk,bhkd->bhqd', probs, v)
    ctx = ctx.transpose(0, 2, 1, 3).reshape(b, s, h)
    out = ctx @ params['wo'].T + params['bo']
    return out, probs


if __name__ == "__main__":
    key = jax.random.PRNGKey(0)
    keys = jax.random.split(key, 9)

    x = jax.random.normal(keys[0], (B, S, HIDDEN), dtype=jnp.float32)

    w_scale = 1.0 / math.sqrt(HIDDEN)
    params = {
        'wq': jax.random.normal(keys[1], (HIDDEN, HIDDEN), jnp.float32) * w_scale,
        'bq': jax.random.normal(keys[2], (HIDDEN,), jnp.float32) * 0.01,
        'wk': jax.random.normal(keys[3], (HIDDEN, HIDDEN), jnp.float32) * w_scale,
        'bk': jax.random.normal(keys[4], (HIDDEN,), jnp.float32) * 0.01,
        'wv': jax.random.normal(keys[5], (HIDDEN, HIDDEN), jnp.float32) * w_scale,
        'bv': jax.random.normal(keys[6], (HIDDEN,), jnp.float32) * 0.01,
        'wo': jax.random.normal(keys[7], (HIDDEN, HIDDEN), jnp.float32) * w_scale,
        'bo': jax.random.normal(keys[8], (HIDDEN,), jnp.float32) * 0.01,
    }

    # vis=True path (matches the module's default behaviour of returning weights)
    out, weights = attention_forward(x, params, vis=True)
    out = jax.block_until_ready(out)
    weights = jax.block_until_ready(weights)

    ref_out, ref_w = _reference(x, params, NUM_HEADS)
    assert out.shape == (B, S, HIDDEN)
    assert weights.shape == (B, NUM_HEADS, S, S)
    assert jnp.allclose(out, ref_out, atol=1e-4, rtol=1e-4)
    assert jnp.allclose(weights, ref_w, atol=1e-4, rtol=1e-4)

    # vis=False path: no probs output computed or written.
    out_nv, w_nv = attention_forward(x, params, vis=False)
    out_nv = jax.block_until_ready(out_nv)
    assert w_nv is None
    assert jnp.allclose(out_nv, ref_out, atol=1e-4, rtol=1e-4)

    print("KERNEL_OK")
</pallas_src>

<mosaic_0001>
module attributes {stable_mosaic.version = 11 : i64} {
  func.func @_attention_kernel(%arg0: memref<16x32xf32, #tpu.memory_space<vmem>>, %arg1: memref<32x96xf32, #tpu.memory_space<vmem>>, %arg2: memref<1x96xf32, #tpu.memory_space<vmem>>, %arg3: memref<32x32xf32, #tpu.memory_space<vmem>>, %arg4: memref<1x32xf32, #tpu.memory_space<vmem>>, %arg5: memref<16x32xf32, #tpu.memory_space<vmem>>, %arg6: memref<8x8x8xf32, #tpu.memory_space<vmem>>) attributes {dimension_semantics = [], scalar_prefetch = 0 : i64, scratch_operands = 0 : i64, tpu.core_type = #tpu.core_type<tc>} {
    %c0 = arith.constant 0 : index
    %c0_0 = arith.constant 0 : index
    %0 = vector.load %arg0[%c0, %c0_0] : memref<16x32xf32, #tpu.memory_space<vmem>>, vector<16x32xf32>
    %c0_1 = arith.constant 0 : index
    %c0_2 = arith.constant 0 : index
    %1 = vector.load %arg1[%c0_1, %c0_2] : memref<32x96xf32, #tpu.memory_space<vmem>>, vector<32x96xf32>
    %cst = arith.constant dense<0.000000e+00> : vector<16x96xf32>
    %2 = tpu.matmul %0, %1, %cst {dimension_numbers = #tpu.dot_dimension_numbers<[1], [0], [0], [1], [0, 0, 1, 1], [], []>} : vector<16x32xf32>, vector<32x96xf32>, vector<16x96xf32> -> vector<16x96xf32>
    %c0_3 = arith.constant 0 : index
    %c0_4 = arith.constant 0 : index
    %3 = vector.load %arg2[%c0_3, %c0_4] : memref<1x96xf32, #tpu.memory_space<vmem>>, vector<1x96xf32>
    %4 = vector.broadcast %3 : vector<1x96xf32> to vector<16x96xf32>
    %5 = arith.addf %2, %4 : vector<16x96xf32>
    %c0_5 = arith.constant 0 : index
    %c0_6 = arith.constant 0 : index
    %6 = vector.load %arg3[%c0_5, %c0_6] : memref<32x32xf32, #tpu.memory_space<vmem>>, vector<32x32xf32>
    %c0_7 = arith.constant 0 : index
    %c0_8 = arith.constant 0 : index
    %7 = vector.load %arg4[%c0_7, %c0_8] : memref<1x32xf32, #tpu.memory_space<vmem>>, vector<1x32xf32>
    %cst_9 = arith.constant 0.000000e+00 : f32
    %8 = vector.broadcast %cst_9 : f32 to vector<8x32xf32>
    %9 = vector.extract_strided_slice %5 {offsets = [0, 0], sizes = [8, 8], strides = [1, 1]} : vector<16x96xf32> to vector<8x8xf32>
    %10 = vector.extract_strided_slice %5 {offsets = [0, 32], sizes = [8, 8], strides = [1, 1]} : vector<16x96xf32> to vector<8x8xf32>
    %11 = vector.extract_strided_slice %5 {offsets = [0, 64], sizes = [8, 8], strides = [1, 1]} : vector<16x96xf32> to vector<8x8xf32>
    %cst_10 = arith.constant dense<0.000000e+00> : vector<8x8xf32>
    %12 = tpu.matmul %9, %10, %cst_10 {dimension_numbers = #tpu.dot_dimension_numbers<[1], [1], [0], [0], [0, 0, 1, 0], [], []>} : vector<8x8xf32>, vector<8x8xf32>, vector<8x8xf32> -> vector<8x8xf32>
    %cst_11 = arith.constant 0.353553385 : f32
    %13 = vector.broadcast %cst_11 : f32 to vector<8x8xf32>
    %14 = arith.mulf %12, %13 : vector<8x8xf32>
    %cst_12 = arith.constant dense<0xFF800000> : vector<8xf32>
    %15 = vector.multi_reduction <maximumf>, %14, %cst_12 [1] : vector<8x8xf32> to vector<8xf32>
    %16 = vector.shape_cast %15 : vector<8xf32> to vector<8x1xf32>
    %17 = vector.broadcast %16 : vector<8x1xf32> to vector<8x8xf32>
    %18 = arith.subf %14, %17 : vector<8x8xf32>
    %19 = math.exp %18 : vector<8x8xf32>
    %cst_13 = arith.constant dense<0.000000e+00> : vector<8xf32>
    %20 = vector.multi_reduction <add>, %19, %cst_13 [1] : vector<8x8xf32> to vector<8xf32>
    %21 = vector.shape_cast %20 : vector<8xf32> to vector<8x1xf32>
    %22 = tpu.reciprocal %21 {approx = true} : vector<8x1xf32> -> vector<8x1xf32>
    %23 = arith.mulf %21, %22 : vector<8x1xf32>
    %cst_14 = arith.constant 2.000000e+00 : f32
    %24 = vector.broadcast %cst_14 : f32 to vector<8x1xf32>
    %25 = arith.subf %24, %23 : vector<8x1xf32>
    %26 = arith.mulf %22, %25 : vector<8x1xf32>
    %27 = vector.broadcast %26 : vector<8x1xf32> to vector<8x8xf32>
    %28 = arith.mulf %19, %27 : vector<8x8xf32>
    %c0_15 = arith.constant 0 : index
    %c0_16 = arith.constant 0 : index
    %c0_17 = arith.constant 0 : index
    %29 = vector.load %arg6[%c0_15, %c0_16, %c0_17] : memref<8x8x8xf32, #tpu.memory_space<vmem>>, vector<1x8x8xf32>
    %30 = vector.shape_cast %29 : vector<1x8x8xf32> to vector<8x8xf32>
    %31 = vector.shape_cast %28 : vector<8x8xf32> to vector<1x8x8xf32>
    tpu.vector_store %arg6[%c0_15, %c0_16, %c0_17], %31 {strides = array<i32>} : memref<8x8x8xf32, #tpu.memory_space<vmem>>, vector<1x8x8xf32>,
    %cst_18 = arith.constant dense<0.000000e+00> : vector<8x8xf32>
    %32 = tpu.matmul %28, %11, %cst_18 {dimension_numbers = #tpu.dot_dimension_numbers<[1], [0], [0], [1], [0, 0, 1, 1], [], []>} : vector<8x8xf32>, vector<8x8xf32>, vector<8x8xf32> -> vector<8x8xf32>
    %33 = vector.extract_strided_slice %6 {offsets = [0, 0], sizes = [8, 32], strides = [1, 1]} : vector<32x32xf32> to vector<8x32xf32>
    %cst_19 = arith.constant dense<0.000000e+00> : vector<8x32xf32>
    %34 = tpu.matmul %32, %33, %cst_19 {dimension_numbers = #tpu.dot_dimension_numbers<[1], [0], [0], [1], [0, 0, 1, 1], [], []>} : vector<8x8xf32>, vector<8x32xf32>, vector<8x32xf32> -> vector<8x32xf32>
    %35 = arith.addf %8, %34 : vector<8x32xf32>
    %36 = vector.extract_strided_slice %5 {offsets = [0, 8], sizes = [8, 8], strides = [1, 1]} : vector<16x96xf32> to vector<8x8xf32>
    %37 = vector.extract_strided_slice %5 {offsets = [0, 40], sizes = [8, 8], strides = [1, 1]} : vector<16x96xf32> to vector<8x8xf32>
    %38 = vector.extract_strided_slice %5 {offsets = [0, 72], sizes = [8, 8], strides = [1, 1]} : vector<16x96xf32> to vector<8x8xf32>
    %cst_20 = arith.constant dense<0.000000e+00> : vector<8x8xf32>
    %39 = tpu.matmul %36, %37, %cst_20 {dimension_numbers = #tpu.dot_dimension_numbers<[1], [1], [0], [0], [0, 0, 1, 0], [], []>} : vector<8x8xf32>, vector<8x8xf32>, vector<8x8xf32> -> vector<8x8xf32>
    %cst_21 = arith.constant 0.353553385 : f32
    %40 = vector.broadcast %cst_21 : f32 to vector<8x8xf32>
    %41 = arith.mulf %39, %40 : vector<8x8xf32>
    %cst_22 = arith.constant dense<0xFF800000> : vector<8xf32>
    %42 = vector.multi_reduction <maximumf>, %41, %cst_22 [1] : vector<8x8xf32> to vector<8xf32>
    %43 = vector.shape_cast %42 : vector<8xf32> to vector<8x1xf32>
    %44 = vector.broadcast %43 : vector<8x1xf32> to vector<8x8xf32>
    %45 = arith.subf %41, %44 : vector<8x8xf32>
    %46 = math.exp %45 : vector<8x8xf32>
    %cst_23 = arith.constant dense<0.000000e+00> : vector<8xf32>
    %47 = vector.multi_reduction <add>, %46, %cst_23 [1] : vector<8x8xf32> to vector<8xf32>
    %48 = vector.shape_cast %47 : vector<8xf32> to vector<8x1xf32>
    %49 = tpu.reciprocal %48 {approx = true} : vector<8x1xf32> -> vector<8x1xf32>
    %50 = arith.mulf %48, %49 : vector<8x1xf32>
    %cst_24 = arith.constant 2.000000e+00 : f32
    %51 = vector.broadcast %cst_24 : f32 to vector<8x1xf32>
    %52 = arith.subf %51, %50 : vector<8x1xf32>
    %53 = arith.mulf %49, %52 : vector<8x1xf32>
    %54 = vector.broadcast %53 : vector<8x1xf32> to vector<8x8xf32>
    %55 = arith.mulf %46, %54 : vector<8x8xf32>
    %c1 = arith.constant 1 : index
    %c0_25 = arith.constant 0 : index
    %c0_26 = arith.constant 0 : index
    %56 = vector.load %arg6[%c1, %c0_25, %c0_26] : memref<8x8x8xf32, #tpu.memory_space<vmem>>, vector<1x8x8xf32>
    %57 = vector.shape_cast %56 : vector<1x8x8xf32> to vector<8x8xf32>
    %58 = vector.shape_cast %55 : vector<8x8xf32> to vector<1x8x8xf32>
    tpu.vector_store %arg6[%c1, %c0_25, %c0_26], %58 {strides = array<i32>} : memref<8x8x8xf32, #tpu.memory_space<vmem>>, vector<1x8x8xf32>,
    %cst_27 = arith.constant dense<0.000000e+00> : vector<8x8xf32>
    %59 = tpu.matmul %55, %38, %cst_27 {dimension_numbers = #tpu.dot_dimension_numbers<[1], [0], [0], [1], [0, 0, 1, 1], [], []>} : vector<8x8xf32>, vector<8x8xf32>, vector<8x8xf32> -> vector<8x8xf32>
    %60 = vector.extract_strided_slice %6 {offsets = [8, 0], sizes = [8, 32], strides = [1, 1]} : vector<32x32xf32> to vector<8x32xf32>
    %cst_28 = arith.constant dense<0.000000e+00> : vector<8x32xf32>
    %61 = tpu.matmul %59, %60, %cst_28 {dimension_numbers = #tpu.dot_dimension_numbers<[1], [0], [0], [1], [0, 0, 1, 1], [], []>} : vector<8x8xf32>, vector<8x32xf32>, vector<8x32xf32> -> vector<8x32xf32>
    %62 = arith.addf %35, %61 : vector<8x32xf32>
    %63 = vector.extract_strided_slice %5 {offsets = [0, 16], sizes = [8, 8], strides = [1, 1]} : vector<16x96xf32> to vector<8x8xf32>
    %64 = vector.extract_strided_slice %5 {offsets = [0, 48], sizes = [8, 8], strides = [1, 1]} : vector<16x96xf32> to vector<8x8xf32>
    %65 = vector.extract_strided_slice %5 {offsets = [0, 80], sizes = [8, 8], strides = [1, 1]} : vector<16x96xf32> to vector<8x8xf32>
    %cst_29 = arith.constant dense<0.000000e+00> : vector<8x8xf32>
    %66 = tpu.matmul %63, %64, %cst_29 {dimension_numbers = #tpu.dot_dimension_numbers<[1], [1], [0], [0], [0, 0, 1, 0], [], []>} : vector<8x8xf32>, vector<8x8xf32>, vector<8x8xf32> -> vector<8x8xf32>
    %cst_30 = arith.constant 0.353553385 : f32
    %67 = vector.broadcast %cst_30 : f32 to vector<8x8xf32>
    %68 = arith.mulf %66, %67 : vector<8x8xf32>
    %cst_31 = arith.constant dense<0xFF800000> : vector<8xf32>
    %69 = vector.multi_reduction <maximumf>, %68, %cst_31 [1] : vector<8x8xf32> to vector<8xf32>
    %70 = vector.shape_cast %69 : vector<8xf32> to vector<8x1xf32>
    %71 = vector.broadcast %70 : vector<8x1xf32> to vector<8x8xf32>
    %72 = arith.subf %68, %71 : vector<8x8xf32>
    %73 = math.exp %72 : vector<8x8xf32>
    %cst_32 = arith.constant dense<0.000000e+00> : vector<8xf32>
    %74 = vector.multi_reduction <add>, %73, %cst_32 [1] : vector<8x8xf32> to vector<8xf32>
    %75 = vector.shape_cast %74 : vector<8xf32> to vector<8x1xf32>
    %76 = tpu.reciprocal %75 {approx = true} : vector<8x1xf32> -> vector<8x1xf32>
    %77 = arith.mulf %75, %76 : vector<8x1xf32>
    %cst_33 = arith.constant 2.000000e+00 : f32
    %78 = vector.broadcast %cst_33 : f32 to vector<8x1xf32>
    %79 = arith.subf %78, %77 : vector<8x1xf32>
    %80 = arith.mulf %76, %79 : vector<8x1xf32>
    %81 = vector.broadcast %80 : vector<8x1xf32> to vector<8x8xf32>
    %82 = arith.mulf %73, %81 : vector<8x8xf32>
    %c2 = arith.constant 2 : index
    %c0_34 = arith.constant 0 : index
    %c0_35 = arith.constant 0 : index
    %83 = vector.load %arg6[%c2, %c0_34, %c0_35] : memref<8x8x8xf32, #tpu.memory_space<vmem>>, vector<1x8x8xf32>
    %84 = vector.shape_cast %83 : vector<1x8x8xf32> to vector<8x8xf32>
    %85 = vector.shape_cast %82 : vector<8x8xf32> to vector<1x8x8xf32>
    tpu.vector_store %arg6[%c2, %c0_34, %c0_35], %85 {strides = array<i32>} : memref<8x8x8xf32, #tpu.memory_space<vmem>>, vector<1x8x8xf32>,
    %cst_36 = arith.constant dense<0.000000e+00> : vector<8x8xf32>
    %86 = tpu.matmul %82, %65, %cst_36 {dimension_numbers = #tpu.dot_dimension_numbers<[1], [0], [0], [1], [0, 0, 1, 1], [], []>} : vector<8x8xf32>, vector<8x8xf32>, vector<8x8xf32> -> vector<8x8xf32>
    %87 = vector.extract_strided_slice %6 {offsets = [16, 0], sizes = [8, 32], strides = [1, 1]} : vector<32x32xf32> to vector<8x32xf32>
    %cst_37 = arith.constant dense<0.000000e+00> : vector<8x32xf32>
    %88 = tpu.matmul %86, %87, %cst_37 {dimension_numbers = #tpu.dot_dimension_numbers<[1], [0], [0], [1], [0, 0, 1, 1], [], []>} : vector<8x8xf32>, vector<8x32xf32>, vector<8x32xf32> -> vector<8x32xf32>
    %89 = arith.addf %62, %88 : vector<8x32xf32>
    %90 = vector.extract_strided_slice %5 {offsets = [0, 24], sizes = [8, 8], strides = [1, 1]} : vector<16x96xf32> to vector<8x8xf32>
    %91 = vector.extract_strided_slice %5 {offsets = [0, 56], sizes = [8, 8], strides = [1, 1]} : vector<16x96xf32> to vector<8x8xf32>
    %92 = vector.extract_strided_slice %5 {offsets = [0, 88], sizes = [8, 8], strides = [1, 1]} : vector<16x96xf32> to vector<8x8xf32>
    %cst_38 = arith.constant dense<0.000000e+00> : vector<8x8xf32>
    %93 = tpu.matmul %90, %91, %cst_38 {dimension_numbers = #tpu.dot_dimension_numbers<[1], [1], [0], [0], [0, 0, 1, 0], [], []>} : vector<8x8xf32>, vector<8x8xf32>, vector<8x8xf32> -> vector<8x8xf32>
    %cst_39 = arith.constant 0.353553385 : f32
    %94 = vector.broadcast %cst_39 : f32 to vector<8x8xf32>
    %95 = arith.mulf %93, %94 : vector<8x8xf32>
    %cst_40 = arith.constant dense<0xFF800000> : vector<8xf32>
    %96 = vector.multi_reduction <maximumf>, %95, %cst_40 [1] : vector<8x8xf32> to vector<8xf32>
    %97 = vector.shape_cast %96 : vector<8xf32> to vector<8x1xf32>
    %98 = vector.broadcast %97 : vector<8x1xf32> to vector<8x8xf32>
    %99 = arith.subf %95, %98 : vector<8x8xf32>
    %100 = math.exp %99 : vector<8x8xf32>
    %cst_41 = arith.constant dense<0.000000e+00> : vector<8xf32>
    %101 = vector.multi_reduction <add>, %100, %cst_41 [1] : vector<8x8xf32> to vector<8xf32>
    %102 = vector.shape_cast %101 : vector<8xf32> to vector<8x1xf32>
    %103 = tpu.reciprocal %102 {approx = true} : vector<8x1xf32> -> vector<8x1xf32>
    %104 = arith.mulf %102, %103 : vector<8x1xf32>
    %cst_42 = arith.constant 2.000000e+00 : f32
    %105 = vector.broadcast %cst_42 : f32 to vector<8x1xf32>
    %106 = arith.subf %105, %104 : vector<8x1xf32>
    %107 = arith.mulf %103, %106 : vector<8x1xf32>
    %108 = vector.broadcast %107 : vector<8x1xf32> to vector<8x8xf32>
    %109 = arith.mulf %100, %108 : vector<8x8xf32>
    %c3 = arith.constant 3 : index
    %c0_43 = arith.constant 0 : index
    %c0_44 = arith.constant 0 : index
    %110 = vector.load %arg6[%c3, %c0_43, %c0_44] : memref<8x8x8xf32, #tpu.memory_space<vmem>>, vector<1x8x8xf32>
    %111 = vector.shape_cast %110 : vector<1x8x8xf32> to vector<8x8xf32>
    %112 = vector.shape_cast %109 : vector<8x8xf32> to vector<1x8x8xf32>
    tpu.vector_store %arg6[%c3, %c0_43, %c0_44], %112 {strides = array<i32>} : memref<8x8x8xf32, #tpu.memory_space<vmem>>, vector<1x8x8xf32>,
    %cst_45 = arith.constant dense<0.000000e+00> : vector<8x8xf32>
    %113 = tpu.matmul %109, %92, %cst_45 {dimension_numbers = #tpu.dot_dimension_numbers<[1], [0], [0], [1], [0, 0, 1, 1], [], []>} : vector<8x8xf32>, vector<8x8xf32>, vector<8x8xf32> -> vector<8x8xf32>
    %114 = vector.extract_strided_slice %6 {offsets = [24, 0], sizes = [8, 32], strides = [1, 1]} : vector<32x32xf32> to vector<8x32xf32>
    %cst_46 = arith.constant dense<0.000000e+00> : vector<8x32xf32>
    %115 = tpu.matmul %113, %114, %cst_46 {dimension_numbers = #tpu.dot_dimension_numbers<[1], [0], [0], [1], [0, 0, 1, 1], [], []>} : vector<8x8xf32>, vector<8x32xf32>, vector<8x32xf32> -> vector<8x32xf32>
    %116 = arith.addf %89, %115 : vector<8x32xf32>
    %117 = vector.broadcast %7 : vector<1x32xf32> to vector<8x32xf32>
    %118 = arith.addf %116, %117 : vector<8x32xf32>
    %c0_47 = arith.constant 0 : index
    %c0_48 = arith.constant 0 : index
    %119 = vector.load %arg5[%c0_47, %c0_48] : memref<16x32xf32, #tpu.memory_space<vmem>>, vector<8x32xf32>
    tpu.vector_store %arg5[%c0_47, %c0_48], %118 {strides = array<i32>} : memref<16x32xf32, #tpu.memory_space<vmem>>, vector<8x32xf32>,
    %cst_49 = arith.constant 0.000000e+00 : f32
    %120 = vector.broadcast %cst_49 : f32 to vector<8x32xf32>
    %121 = vector.extract_strided_slice %5 {offsets = [8, 0], sizes = [8, 8], strides = [1, 1]} : vector<16x96xf32> to vector<8x8xf32>
    %122 = vector.extract_strided_slice %5 {offsets = [8, 32], sizes = [8, 8], strides = [1, 1]} : vector<16x96xf32> to vector<8x8xf32>
    %123 = vector.extract_strided_slice %5 {offsets = [8, 64], sizes = [8, 8], strides = [1, 1]} : vector<16x96xf32> to vector<8x8xf32>
    %cst_50 = arith.constant dense<0.000000e+00> : vector<8x8xf32>
    %124 = tpu.matmul %121, %122, %cst_50 {dimension_numbers = #tpu.dot_dimension_numbers<[1], [1], [0], [0], [0, 0, 1, 0], [], []>} : vector<8x8xf32>, vector<8x8xf32>, vector<8x8xf32> -> vector<8x8xf32>
    %cst_51 = arith.constant 0.353553385 : f32
    %125 = vector.broadcast %cst_51 : f32 to vector<8x8xf32>
    %126 = arith.mulf %124, %125 : vector<8x8xf32>
    %cst_52 = arith.constant dense<0xFF800000> : vector<8xf32>
    %127 = vector.multi_reduction <maximumf>, %126, %cst_52 [1] : vector<8x8xf32> to vector<8xf32>
    %128 = vector.shape_cast %127 : vector<8xf32> to vector<8x1xf32>
    %129 = vector.broadcast %128 : vector<8x1xf32> to vector<8x8xf32>
    %130 = arith.subf %126, %129 : vector<8x8xf32>
    %131 = math.exp %130 : vector<8x8xf32>
    %cst_53 = arith.constant dense<0.000000e+00> : vector<8xf32>
    %132 = vector.multi_reduction <add>, %131, %cst_53 [1] : vector<8x8xf32> to vector<8xf32>
    %133 = vector.shape_cast %132 : vector<8xf32> to vector<8x1xf32>
    %134 = tpu.reciprocal %133 {approx = true} : vector<8x1xf32> -> vector<8x1xf32>
    %135 = arith.mulf %133, %134 : vector<8x1xf32>
    %cst_54 = arith.constant 2.000000e+00 : f32
    %136 = vector.broadcast %cst_54 : f32 to vector<8x1xf32>
    %137 = arith.subf %136, %135 : vector<8x1xf32>
    %138 = arith.mulf %134, %137 : vector<8x1xf32>
    %139 = vector.broadcast %138 : vector<8x1xf32> to vector<8x8xf32>
    %140 = arith.mulf %131, %139 : vector<8x8xf32>
    %c4 = arith.constant 4 : index
    %c0_55 = arith.constant 0 : index
    %c0_56 = arith.constant 0 : index
    %141 = vector.load %arg6[%c4, %c0_55, %c0_56] : memref<8x8x8xf32, #tpu.memory_space<vmem>>, vector<1x8x8xf32>
    %142 = vector.shape_cast %141 : vector<1x8x8xf32> to vector<8x8xf32>
    %143 = vector.shape_cast %140 : vector<8x8xf32> to vector<1x8x8xf32>
    tpu.vector_store %arg6[%c4, %c0_55, %c0_56], %143 {strides = array<i32>} : memref<8x8x8xf32, #tpu.memory_space<vmem>>, vector<1x8x8xf32>,
    %cst_57 = arith.constant dense<0.000000e+00> : vector<8x8xf32>
    %144 = tpu.matmul %140, %123, %cst_57 {dimension_numbers = #tpu.dot_dimension_numbers<[1], [0], [0], [1], [0, 0, 1, 1], [], []>} : vector<8x8xf32>, vector<8x8xf32>, vector<8x8xf32> -> vector<8x8xf32>
    %145 = vector.extract_strided_slice %6 {offsets = [0, 0], sizes = [8, 32], strides = [1, 1]} : vector<32x32xf32> to vector<8x32xf32>
    %cst_58 = arith.constant dense<0.000000e+00> : vector<8x32xf32>
    %146 = tpu.matmul %144, %145, %cst_58 {dimension_numbers = #tpu.dot_dimension_numbers<[1], [0], [0], [1], [0, 0, 1, 1], [], []>} : vector<8x8xf32>, vector<8x32xf32>, vector<8x32xf32> -> vector<8x32xf32>
    %147 = arith.addf %120, %146 : vector<8x32xf32>
    %148 = vector.extract_strided_slice %5 {offsets = [8, 8], sizes = [8, 8], strides = [1, 1]} : vector<16x96xf32> to vector<8x8xf32>
    %149 = vector.extract_strided_slice %5 {offsets = [8, 40], sizes = [8, 8], strides = [1, 1]} : vector<16x96xf32> to vector<8x8xf32>
    %150 = vector.extract_strided_slice %5 {offsets = [8, 72], sizes = [8, 8], strides = [1, 1]} : vector<16x96xf32> to vector<8x8xf32>
    %cst_59 = arith.constant dense<0.000000e+00> : vector<8x8xf32>
    %151 = tpu.matmul %148, %149, %cst_59 {dimension_numbers = #tpu.dot_dimension_numbers<[1], [1], [0], [0], [0, 0, 1, 0], [], []>} : vector<8x8xf32>, vector<8x8xf32>, vector<8x8xf32> -> vector<8x8xf32>
    %cst_60 = arith.constant 0.353553385 : f32
    %152 = vector.broadcast %cst_60 : f32 to vector<8x8xf32>
    %153 = arith.mulf %151, %152 : vector<8x8xf32>
    %cst_61 = arith.constant dense<0xFF800000> : vector<8xf32>
    %154 = vector.multi_reduction <maximumf>, %153, %cst_61 [1] : vector<8x8xf32> to vector<8xf32>
    %155 = vector.shape_cast %154 : vector<8xf32> to vector<8x1xf32>
    %156 = vector.broadcast %155 : vector<8x1xf32> to vector<8x8xf32>
    %157 = arith.subf %153, %156 : vector<8x8xf32>
    %158 = math.exp %157 : vector<8x8xf32>
    %cst_62 = arith.constant dense<0.000000e+00> : vector<8xf32>
    %159 = vector.multi_reduction <add>, %158, %cst_62 [1] : vector<8x8xf32> to vector<8xf32>
    %160 = vector.shape_cast %159 : vector<8xf32> to vector<8x1xf32>
    %161 = tpu.reciprocal %160 {approx = true} : vector<8x1xf32> -> vector<8x1xf32>
    %162 = arith.mulf %160, %161 : vector<8x1xf32>
    %cst_63 = arith.constant 2.000000e+00 : f32
    %163 = vector.broadcast %cst_63 : f32 to vector<8x1xf32>
    %164 = arith.subf %163, %162 : vector<8x1xf32>
    %165 = arith.mulf %161, %164 : vector<8x1xf32>
    %166 = vector.broadcast %165 : vector<8x1xf32> to vector<8x8xf32>
    %167 = arith.mulf %158, %166 : vector<8x8xf32>
    %c5 = arith.constant 5 : index
    %c0_64 = arith.constant 0 : index
    %c0_65 = arith.constant 0 : index
    %168 = vector.load %arg6[%c5, %c0_64, %c0_65] : memref<8x8x8xf32, #tpu.memory_space<vmem>>, vector<1x8x8xf32>
    %169 = vector.shape_cast %168 : vector<1x8x8xf32> to vector<8x8xf32>
    %170 = vector.shape_cast %167 : vector<8x8xf32> to vector<1x8x8xf32>
    tpu.vector_store %arg6[%c5, %c0_64, %c0_65], %170 {strides = array<i32>} : memref<8x8x8xf32, #tpu.memory_space<vmem>>, vector<1x8x8xf32>,
    %cst_66 = arith.constant dense<0.000000e+00> : vector<8x8xf32>
    %171 = tpu.matmul %167, %150, %cst_66 {dimension_numbers = #tpu.dot_dimension_numbers<[1], [0], [0], [1], [0, 0, 1, 1], [], []>} : vector<8x8xf32>, vector<8x8xf32>, vector<8x8xf32> -> vector<8x8xf32>
    %172 = vector.extract_strided_slice %6 {offsets = [8, 0], sizes = [8, 32], strides = [1, 1]} : vector<32x32xf32> to vector<8x32xf32>
    %cst_67 = arith.constant dense<0.000000e+00> : vector<8x32xf32>
    %173 = tpu.matmul %171, %172, %cst_67 {dimension_numbers = #tpu.dot_dimension_numbers<[1], [0], [0], [1], [0, 0, 1, 1], [], []>} : vector<8x8xf32>, vector<8x32xf32>, vector<8x32xf32> -> vector<8x32xf32>
    %174 = arith.addf %147, %173 : vector<8x32xf32>
    %175 = vector.extract_strided_slice %5 {offsets = [8, 16], sizes = [8, 8], strides = [1, 1]} : vector<16x96xf32> to vector<8x8xf32>
    %176 = vector.extract_strided_slice %5 {offsets = [8, 48], sizes = [8, 8], strides = [1, 1]} : vector<16x96xf32> to vector<8x8xf32>
    %177 = vector.extract_strided_slice %5 {offsets = [8, 80], sizes = [8, 8], strides = [1, 1]} : vector<16x96xf32> to vector<8x8xf32>
    %cst_68 = arith.constant dense<0.000000e+00> : vector<8x8xf32>
    %178 = tpu.matmul %175, %176, %cst_68 {dimension_numbers = #tpu.dot_dimension_numbers<[1], [1], [0], [0], [0, 0, 1, 0], [], []>} : vector<8x8xf32>, vector<8x8xf32>, vector<8x8xf32> -> vector<8x8xf32>
    %cst_69 = arith.constant 0.353553385 : f32
    %179 = vector.broadcast %cst_69 : f32 to vector<8x8xf32>
    %180 = arith.mulf %178, %179 : vector<8x8xf32>
    %cst_70 = arith.constant dense<0xFF800000> : vector<8xf32>
    %181 = vector.multi_reduction <maximumf>, %180, %cst_70 [1] : vector<8x8xf32> to vector<8xf32>
    %182 = vector.shape_cast %181 : vector<8xf32> to vector<8x1xf32>
    %183 = vector.broadcast %182 : vector<8x1xf32> to vector<8x8xf32>
    %184 = arith.subf %180, %183 : vector<8x8xf32>
    %185 = math.exp %184 : vector<8x8xf32>
    %cst_71 = arith.constant dense<0.000000e+00> : vector<8xf32>
    %186 = vector.multi_reduction <add>, %185, %cst_71 [1] : vector<8x8xf32> to vector<8xf32>
    %187 = vector.shape_cast %186 : vector<8xf32> to vector<8x1xf32>
    %188 = tpu.reciprocal %187 {approx = true} : vector<8x1xf32> -> vector<8x1xf32>
    %189 = arith.mulf %187, %188 : vector<8x1xf32>
    %cst_72 = arith.constant 2.000000e+00 : f32
    %190 = vector.broadcast %cst_72 : f32 to vector<8x1xf32>
    %191 = arith.subf %190, %189 : vector<8x1xf32>
    %192 = arith.mulf %188, %191 : vector<8x1xf32>
    %193 = vector.broadcast %192 : vector<8x1xf32> to vector<8x8xf32>
    %194 = arith.mulf %185, %193 : vector<8x8xf32>
    %c6 = arith.constant 6 : index
    %c0_73 = arith.constant 0 : index
    %c0_74 = arith.constant 0 : index
    %195 = vector.load %arg6[%c6, %c0_73, %c0_74] : memref<8x8x8xf32, #tpu.memory_space<vmem>>, vector<1x8x8xf32>
    %196 = vector.shape_cast %195 : vector<1x8x8xf32> to vector<8x8xf32>
    %197 = vector.shape_cast %194 : vector<8x8xf32> to vector<1x8x8xf32>
    tpu.vector_store %arg6[%c6, %c0_73, %c0_74], %197 {strides = array<i32>} : memref<8x8x8xf32, #tpu.memory_space<vmem>>, vector<1x8x8xf32>,
    %cst_75 = arith.constant dense<0.000000e+00> : vector<8x8xf32>
    %198 = tpu.matmul %194, %177, %cst_75 {dimension_numbers = #tpu.dot_dimension_numbers<[1], [0], [0], [1], [0, 0, 1, 1], [], []>} : vector<8x8xf32>, vector<8x8xf32>, vector<8x8xf32> -> vector<8x8xf32>
    %199 = vector.extract_strided_slice %6 {offsets = [16, 0], sizes = [8, 32], strides = [1, 1]} : vector<32x32xf32> to vector<8x32xf32>
    %cst_76 = arith.constant dense<0.000000e+00> : vector<8x32xf32>
    %200 = tpu.matmul %198, %199, %cst_76 {dimension_numbers = #tpu.dot_dimension_numbers<[1], [0], [0], [1], [0, 0, 1, 1], [], []>} : vector<8x8xf32>, vector<8x32xf32>, vector<8x32xf32> -> vector<8x32xf32>
    %201 = arith.addf %174, %200 : vector<8x32xf32>
    %202 = vector.extract_strided_slice %5 {offsets = [8, 24], sizes = [8, 8], strides = [1, 1]} : vector<16x96xf32> to vector<8x8xf32>
    %203 = vector.extract_strided_slice %5 {offsets = [8, 56], sizes = [8, 8], strides = [1, 1]} : vector<16x96xf32> to vector<8x8xf32>
    %204 = vector.extract_strided_slice %5 {offsets = [8, 88], sizes = [8, 8], strides = [1, 1]} : vector<16x96xf32> to vector<8x8xf32>
    %cst_77 = arith.constant dense<0.000000e+00> : vector<8x8xf32>
    %205 = tpu.matmul %202, %203, %cst_77 {dimension_numbers = #tpu.dot_dimension_numbers<[1], [1], [0], [0], [0, 0, 1, 0], [], []>} : vector<8x8xf32>, vector<8x8xf32>, vector<8x8xf32> -> vector<8x8xf32>
    %cst_78 = arith.constant 0.353553385 : f32
    %206 = vector.broadcast %cst_78 : f32 to vector<8x8xf32>
    %207 = arith.mulf %205, %206 : vector<8x8xf32>
    %cst_79 = arith.constant dense<0xFF800000> : vector<8xf32>
    %208 = vector.multi_reduction <maximumf>, %207, %cst_79 [1] : vector<8x8xf32> to vector<8xf32>
    %209 = vector.shape_cast %208 : vector<8xf32> to vector<8x1xf32>
    %210 = vector.broadcast %209 : vector<8x1xf32> to vector<8x8xf32>
    %211 = arith.subf %207, %210 : vector<8x8xf32>
    %212 = math.exp %211 : vector<8x8xf32>
    %cst_80 = arith.constant dense<0.000000e+00> : vector<8xf32>
    %213 = vector.multi_reduction <add>, %212, %cst_80 [1] : vector<8x8xf32> to vector<8xf32>
    %214 = vector.shape_cast %213 : vector<8xf32> to vector<8x1xf32>
    %215 = tpu.reciprocal %214 {approx = true} : vector<8x1xf32> -> vector<8x1xf32>
    %216 = arith.mulf %214, %215 : vector<8x1xf32>
    %cst_81 = arith.constant 2.000000e+00 : f32
    %217 = vector.broadcast %cst_81 : f32 to vector<8x1xf32>
    %218 = arith.subf %217, %216 : vector<8x1xf32>
    %219 = arith.mulf %215, %218 : vector<8x1xf32>
    %220 = vector.broadcast %219 : vector<8x1xf32> to vector<8x8xf32>
    %221 = arith.mulf %212, %220 : vector<8x8xf32>
    %c7 = arith.constant 7 : index
    %c0_82 = arith.constant 0 : index
    %c0_83 = arith.constant 0 : index
    %222 = vector.load %arg6[%c7, %c0_82, %c0_83] : memref<8x8x8xf32, #tpu.memory_space<vmem>>, vector<1x8x8xf32>
    %223 = vector.shape_cast %222 : vector<1x8x8xf32> to vector<8x8xf32>
    %224 = vector.shape_cast %221 : vector<8x8xf32> to vector<1x8x8xf32>
    tpu.vector_store %arg6[%c7, %c0_82, %c0_83], %224 {strides = array<i32>} : memref<8x8x8xf32, #tpu.memory_space<vmem>>, vector<1x8x8xf32>,
    %cst_84 = arith.constant dense<0.000000e+00> : vector<8x8xf32>
    %225 = tpu.matmul %221, %204, %cst_84 {dimension_numbers = #tpu.dot_dimension_numbers<[1], [0], [0], [1], [0, 0, 1, 1], [], []>} : vector<8x8xf32>, vector<8x8xf32>, vector<8x8xf32> -> vector<8x8xf32>
    %226 = vector.extract_strided_slice %6 {offsets = [24, 0], sizes = [8, 32], strides = [1, 1]} : vector<32x32xf32> to vector<8x32xf32>
    %cst_85 = arith.constant dense<0.000000e+00> : vector<8x32xf32>
    %227 = tpu.matmul %225, %226, %cst_85 {dimension_numbers = #tpu.dot_dimension_numbers<[1], [0], [0], [1], [0, 0, 1, 1], [], []>} : vector<8x8xf32>, vector<8x32xf32>, vector<8x32xf32> -> vector<8x32xf32>
    %228 = arith.addf %201, %227 : vector<8x32xf32>
    %229 = vector.broadcast %7 : vector<1x32xf32> to vector<8x32xf32>
    %230 = arith.addf %228, %229 : vector<8x32xf32>
    %c8 = arith.constant 8 : index
    %c0_86 = arith.constant 0 : index
    %231 = vector.load %arg5[%c8, %c0_86] : memref<16x32xf32, #tpu.memory_space<vmem>>, vector<8x32xf32>
    tpu.vector_store %arg5[%c8, %c0_86], %230 {strides = array<i32>} : memref<16x32xf32, #tpu.memory_space<vmem>>, vector<8x32xf32>,
    return
  }
}

</mosaic_0001>

<bundles_post_ra>
// kernel: tpu_custom_call.1
= control target key start
LH: loop header
LB: loop body
LE: loop exit
PB: predicated region body
PF: predicated region fallthrough
CT: control target
= control target key end

     0   :  { %12 = vsyncpa [#allocation3], 0  ;;  %s2843_s0 = inlined_call_operand.hbm [shape: f32[16,32], index: 0, kind: input, shape index: {}]   ;;  %s2844_s1 = inlined_call_operand.hbm [shape: f32[32,96], index: 1, kind: input, shape index: {}]   ;;  %s2845_s2 = inlined_call_operand.vmem [shape: f32[1,96], index: 2, kind: input, shape index: {}]   ;;  %s2846_s3 = inlined_call_operand.hbm [shape: f32[32,32], index: 3, kind: input, shape index: {}]   ;;  %s2847_s4 = inlined_call_operand.vmem [shape: f32[1,32], index: 4, kind: input, shape index: {}]   ;;  %s2848_s5 = inlined_call_operand.hbm [shape: f32[16,32], index: 5, kind: output, shape index: {0}]   ;;  %s2849_s6 = inlined_call_operand.hbm [shape: f32[8,8,8], index: 6, kind: output, shape index: {1}]  }
   0x1   :  { %13 = vsyncpa [#allocation6], 0 }
   0x2   :  { %14 = vsyncpa [#allocation4], 0 }
   0x3   :  { %15 = vsyncpa [#allocation10], 0  ;;  %s2544_s21 = smov [#allocation5]   ;;  %s2545_s23 = smov [#allocation2]  }
   0x4   :  { %s33_s22 = sshll.u32 %s2544_s21, 4  ;;  %s21_s24 = sshll.u32 %s2545_s23, 4  ;;  %s34_s22 = int_to_ptr.vmem [resolvable:$true] %s33_s22  ;;  %s22_s24 = int_to_ptr.vmem [resolvable:$true] %s21_s24 }
   0x5   :  { %s2444_s25 = scalar_lea.vmem %s34_s22, 512  ;;  %p2449_p1 = scmp.lt.s32.totalorder %s34_s22, %s34_s22 }
   0x6   :  { %p2445_p0 = scmp.ne.s32.totalorder %s34_s22, %s2444_s25  ;;  %p2450_p2 = scmp.lt.s32.totalorder %s2444_s25, %s2444_s25 }
   0x8   :  { %p2451_p3 = por %p2450_p2, %p2449_p1 }
   0xa   :  { %p2452_p4 = pnand %p2451_p3, %p2445_p0 }
   0xc   :  { %2455 = shalt.err (!%p2452_p4)
}
   0xd   :  { %s2546_s26 = smov 128   ;;  %s2547_s27 = smov 8  }
   0xe   :  { %39 = dma.hbm_to_vmem [thread:$0]  %s2844_s1, 512, %s34_s22, [#allocation6], %s2546_s26, %s2546_s26, %s2547_s27  }
   0xf   :  { %s2464_s30 = scalar_lea.vmem %s22_s24, 256  ;;  %p2469_p6 = scmp.lt.s32.totalorder %s22_s24, %s22_s24 }
  0x10   :  { %p2465_p5 = scmp.ne.s32.totalorder %s22_s24, %s2464_s30  ;;  %p2470_p7 = scmp.lt.s32.totalorder %s2464_s30, %s2464_s30 }
  0x12   :  { %p2471_p8 = por %p2470_p7, %p2469_p6 }
  0x14   :  { %p2472_p9 = pnand %p2471_p8, %p2465_p5 }
  0x16   :  { %2475 = shalt.err (!%p2472_p9)
}
  0x17   :  { %27 = dma.hbm_to_vmem [thread:$0]  %s2843_s0, 256, %s22_s24, [#allocation3], %s2546_s26, %s2546_s26, %s2547_s27  }
  0x18   :  { %s2548_s9 = smov [#allocation7]  }
  0x19   :  { %s47_s10 = sshll.u32 %s2548_s9, 4  ;;  %s48_s10 = int_to_ptr.vmem [resolvable:$true] %s47_s10 }
  0x1a   :  { %s2484_s11 = scalar_lea.vmem %s48_s10, 512  ;;  %p2489_p11 = scmp.lt.s32.totalorder %s48_s10, %s48_s10 }
  0x1b   :  { %p2485_p10 = scmp.ne.s32.totalorder %s48_s10, %s2484_s11  ;;  %p2490_p12 = scmp.lt.s32.totalorder %s2484_s11, %s2484_s11 }
  0x1d   :  { %p2491_p13 = por %p2490_p12, %p2489_p11 }
  0x1f   :  { %p2492_p0 = pnand %p2491_p13, %p2485_p10 }
  0x21   :  { %2495 = shalt.err (!%p2492_p0)
}
  0x22   :  { %53 = dma.hbm_to_vmem [thread:$0]  %s2846_s3, 512, %s48_s10, [#allocation6], %s2546_s26, %s2546_s26, %s2547_s27  }
  0x23   :  { %2536 = dma.done.wait [#allocation3], 256  }
  0x24   :  { %2537 = vsyncadd [#allocation3], 4294967040 }
  0x25   :  { %2538 = dma.done.wait [#allocation6], 1024  }
  0x26   :  { %2539 = vsyncadd [#allocation6], 4294966272  ;;  %vm78_vm0 = vcmask 261120   ;;  %v70_v0 = vld [vmem:[#allocation5 + $0x18] sm:$0xff]  ;;  %v69_v1 = vld [vmem:[#allocation5 + $0x10] sm:$0xff]  ;;  %v2549_v6 = vmov 0.0  }
  0x27   :  { %2253 = vmatprep.subr.mxu0 %v70_v0  ;;  %v65_v2 = vld [vmem:[#allocation2] sm:$0xff]  ;;  %v68_v3 = vld [vmem:[#allocation5 + $0x8] sm:$0xff]  ;;  %v67_v4 = vld [vmem:[#allocation5] sm:$0xff]  ;;  %2264 = vmatprep.subr.mxu1 %v2549_v6  ;;  %vm2550_vm1 = vmmov 0   ;;  %s2551_s13 = smov 120   ;;  %s2552_s14 = smov 96  }
  0x28   :  { %2254 = vmatpush3.msra.mxu0 %v70_v0  ;;  %2261 = vmatprep.mubr.msk.f32.mxu0 %vm78_vm0, %v65_v2  ;;  %v66_v5 = vld [vmem:[#allocation2 + $0x8] sm:$0xff]  ;;  %v2163_v7 = vld [vmem:[%s2845_s2] ss:$0 sm:$0xff]  ;;  %s2553_s15 = smov 88   ;;  %vm168_vm2 = vcmask 64512   ;;  %s2554_s2 = smov 56  }
  0x29   :  { %2255 = vmatprep.subr.mxu0 %v69_v1  ;;  %2266 = vmatprep.mubr.msk.f32.mxu1 %vm2550_vm1, %v2549_v6  ;;  %s2555_s16 = smov 64   ;;  %s2556_s17 = smov 80   ;;  %v2671_v47 = vld [vmem:[#allocation7] sm:$0xff]  ;;  %v2674_v48 = vld [vmem:[#allocation7 + $0x8] sm:$0xff] }
  0x2a   :  { %2256 = vmatpush3.msra.mxu0 %v69_v1  ;;  %s2557_s18 = smov 112   ;;  %s2558_s19 = smov 72  }
  0x2b   :  { %2257 = vmatprep.subr.mxu0 %v68_v3  ;;  %s2559_s20 = smov 104   ;;  %s2560_s21 = smov 48  }
  0x2c   :  { %2258 = vmatpush3.msra.mxu0 %v68_v3  ;;  %s2561_s22 = smov 40  }
  0x2d   :  { %2259 = vmatprep.subr.mxu0 %v67_v4 }
  0x2e   :  { %2260 = vmatpush3.msra.mxu0 %v67_v4 }
  0x2f   :  { %2262 = vmatmul.mubr.msk.f32.vlgmr.msra.gmra.mxu0 %vm78_vm0, %v66_v5  ;;  %2274 = vmatprep.subr.mxu0 %v2549_v6 }
  0x30   :  { %2276 = vmatprep.mubr.msk.f32.mxu0 %vm2550_vm1, %v2549_v6 }
  0xef   :  { %v2263_v8 = vpop.f32.mrf.mxu0 }
  0xf0   :  { %v2628_v9 = vadd.f32 %v2263_v8, %v2163_v7 }
  0xf1   :  { %v151_v10 = vpop.f32.mrf.mxu0 }
  0xf2   :  { %v2630_v11 = vadd.f32 %v2163_v7, %v151_v10 }
  0xf4   :  { %335 = vrot.lane.b32.xlu1 %v2630_v11, %s2551_s13  ;;  %166 = vrot.lane.b32.xlu0 %v2630_v11, %s2552_s14 }
  0xf8   :  { %337 = vrot.lane.b32.xlu0 %v2630_v11, %s2553_s15 }
 0x166   :  { %v167_v12 = vpop.permute.xlu0 %166  ;;  %v336_v14 = vpop.permute.xlu1 %335 }
 0x167   :  { %2265 = vmatpush3.xpose.msk.msra.mxu1 %vm168_vm2, %v167_v12 }
 0x168   :  { %2269 = vmatprep.subr.mxu1 %v2549_v6 }
 0x16a   :  { %2267 = vmatmul.mubr.msk.f32.vlgmr.msra.gmra.mxu1 %vm168_vm2, %v2630_v11  ;;  %v338_v13 = vpop.permute.xlu0 %337 }
 0x16b   :  { %2275 = vmatpush3.xpose.msk.msra.mxu0 %vm168_vm2, %v338_v13  ;;  %2271 = vmatprep.mubr.msk.f32.mxu1 %vm2550_vm1, %v2549_v6 }
 0x16c   :  { %2284 = vmatprep.subr.mxu0 %v2549_v6 }
 0x16e   :  { %2277 = vmatmul.mubr.msk.f32.vlgmr.msra.gmra.mxu0 %vm168_vm2, %v336_v14 }
 0x16f   :  { %2286 = vmatprep.mubr.msk.f32.mxu0 %vm2550_vm1, %v2549_v6  ;;  %2285 = vmatpush3.msra.mxu0 %v2674_v48 }
 0x170   :  { %2294 = vmatprep.subr.mxu0 %v2549_v6 }
 0x22a   :  { %v239_v15 = vpop.f32.mrf.mxu1 }
 0x22b   :  { %v243_v16 = vmul.f32 0.35355338, %v239_v15 }
 0x22c   :  { %v2268_v17 = vpop.f32.mrf.mxu1 }
 0x22d   :  { %v244_v18 = vsel %vm168_vm2, %v243_v16, -inf  ;;  %v2710_v17 = vld [vmem:[#allocation7 + $0x10] sm:$0xff] }
 0x22e   :  { %245 = vmax.xlane.f32.xlu1 %v244_v18  ;;  %v409_v19 = vpop.f32.mrf.mxu0 }
 0x22f   :  { %v413_v20 = vmul.f32 0.35355338, %v409_v19 }
 0x230   :  { %v2278_v21 = vpop.f32.mrf.mxu0 }
 0x231   :  { %v414_v22 = vsel %vm168_vm2, %v413_v20, -inf }
 0x232   :  { %415 = vmax.xlane.f32.xlu0 %v414_v22 }
 0x2b7   :  { %v246_v23 = vpop.xlane.xlu1 %245 }
 0x2b8   :  { %v247_v24 = vsub.f32 %v243_v16, %v246_v23 }
 0x2ba   :  { %v248_v25 = vmul.f32 1.442695, %v247_v24 }
 0x2bb   :  { %v416_v26 = vpop.xlane.xlu0 %415 }
 0x2bc   :  { %2404 = vpow2.f32 %v248_v25  ;;  %v417_v27 = vsub.f32 %v413_v20, %v416_v26 }
 0x2be   :  { %v418_v28 = vmul.f32 1.442695, %v417_v27 }
 0x2c0   :  { %2406 = vpow2.f32 %v418_v28 }
 0x2c9   :  { %v2405_v29 = vpop.eup %2404 }
 0x2ca   :  { %v250_v30 = vsel %vm168_vm2, %v2405_v29, 0.0 }
 0x2cb   :  { %251 = vadd.xlane.f32.xlu0 %v250_v30 }
 0x2cd   :  { %v2407_v31 = vpop.eup %2406 }
 0x2ce   :  { %v420_v32 = vsel %vm168_vm2, %v2407_v31, 0.0 }
 0x2cf   :  { %421 = vadd.xlane.f32.xlu1 %v420_v32 }
 0x2e0   :  { %430 = vrot.lane.b32.xlu1 %v2630_v11, %s2554_s2 }
 0x2e1   :  { %259 = vrot.lane.b32.xlu0 %v2630_v11, %s2555_s16 }
 0x2e4   :  { %654 = vrot.lane.b32.xlu1 %v2630_v11, %s2556_s17 }
 0x2e5   :  { %652 = vrot.lane.b32.xlu0 %v2630_v11, %s2557_s18 }
 0x354   :  { %v252_v33 = vpop.xlane.xlu0 %251 }
 0x355   :  { %2408 = vrcp.f32 %v252_v33 }
 0x358   :  { %v422_v34 = vpop.xlane.xlu1 %421  ;;  %v260_v35 = vpop.permute.xlu0 %259 }
 0x359   :  { %2410 = vrcp.f32 %v422_v34  ;;  %2270 = vmatpush3.msra.mxu1 %v260_v35 }
 0x35a   :  { %2279 = vmatprep.subr.mxu1 %v2549_v6 }
 0x35c   :  { %v431_v45 = vpop.permute.xlu1 %430  ;;  %v653_v54 = vpop.permute.xlu0 %652 }
 0x360   :  { %v655_v52 = vpop.permute.xlu1 %654 }
 0x362   :  { %v2409_v36 = vpop.eup %2408 }
 0x363   :  { %v254_v37 = vmul.f32 %v2409_v36, %v252_v33 }
 0x365   :  { %v255_v38 = vsub.f32 2.0, %v254_v37 }
 0x366   :  { %v2411_v39 = vpop.eup %2410 }
 0x367   :  { %v256_v40 = vmul.f32 %v2409_v36, %v255_v38  ;;  %v424_v41 = vmul.f32 %v2411_v39, %v422_v34 }
 0x369   :  { %v257_v42 = vmul.f32 %v2405_v29, %v256_v40  ;;  %v425_v43 = vsub.f32 2.0, %v424_v41  ;;  %v2748_v41 = vld [vmem:[#allocation7 + $0x18] sm:$0xff] }
 0x36b   :  { %258 = vst.msk [vmem:[#allocation9] sm:$0xff] %vm168_vm2, %v257_v42  ;;  %v426_v44 = vmul.f32 %v2411_v39, %v425_v43  ;;  %2272 = vmatmul.mubr.msk.f32.vlgmr.msra.gmra.mxu1 %vm168_vm2, %v257_v42 }
 0x36c   :  { %2280 = vmatpush3.msra.mxu1 %v431_v45  ;;  %2281 = vmatprep.mubr.msk.f32.mxu1 %vm2550_vm1, %v2549_v6 }
 0x36d   :  { %v427_v46 = vmul.f32 %v2407_v31, %v426_v44  ;;  %2289 = vmatprep.subr.mxu1 %v2549_v6 }
 0x36f   :  { %429 = vst.msk [vmem:[#allocation9 + $0x8] sm:$0xff] %vm168_vm2, %v427_v46  ;;  %2282 = vmatmul.mubr.msk.f32.vlgmr.msra.gmra.mxu1 %vm168_vm2, %v427_v46 }
 0x370   :  { %2291 = vmatprep.mubr.msk.f32.mxu1 %vm2550_vm1, %v2549_v6  ;;  %2290 = vmatpush3.msra.mxu1 %v2671_v47 }
 0x371   :  { %2299 = vmatprep.subr.mxu1 %v2549_v6 }
 0x42b   :  { %v331_v49 = vpop.f32.mrf.mxu1 }
 0x42c   :  { %2292 = vmatmul.mubr.msk.f32.vlgmr.msra.gmra.mxu1 %vm168_vm2, %v331_v49 }
 0x42d   :  { %v2273_v50 = vpop.f32.mrf.mxu1  ;;  %2301 = vmatprep.mubr.msk.f32.mxu1 %vm2550_vm1, %v2549_v6 }
 0x42f   :  { %v502_v51 = vpop.f32.mrf.mxu1 }
 0x430   :  { %2287 = vmatmul.mubr.msk.f32.vlgmr.msra.gmra.mxu0 %vm168_vm2, %v502_v51 }
 0x431   :  { %2295 = vmatpush3.xpose.msk.msra.mxu0 %vm168_vm2, %v655_v52  ;;  %v2283_v53 = vpop.f32.mrf.mxu1  ;;  %2296 = vmatprep.mubr.msk.f32.mxu0 %vm2550_vm1, %v2549_v6 }
 0x432   :  { %2304 = vmatprep.subr.mxu0 %v2549_v6 }
 0x434   :  { %2297 = vmatmul.mubr.msk.f32.vlgmr.msra.gmra.mxu0 %vm168_vm2, %v653_v54 }
 0x435   :  { %2306 = vmatprep.mubr.msk.f32.mxu0 %vm2550_vm1, %v2549_v6  ;;  %2305 = vmatpush3.msra.mxu0 %v2710_v17 }
 0x436   :  { %2314 = vmatprep.subr.mxu0 %v2549_v6 }
 0x4ec   :  { %v648_v55 = vpop.f32.mrf.mxu1 }
 0x4ee   :  { %v2293_v56 = vpop.f32.mrf.mxu1 }
 0x4f0   :  { %v575_v57 = vpop.f32.mrf.mxu0 }
 0x4f1   :  { %v2690_v58 = vadd.f32 %v648_v55, %v575_v57 }
 0x4f2   :  { %v2288_v59 = vpop.f32.mrf.mxu0 }
 0x4f4   :  { %v726_v60 = vpop.f32.mrf.mxu0 }
 0x4f5   :  { %v730_v61 = vmul.f32 0.35355338, %v726_v60 }
 0x4f6   :  { %v2298_v62 = vpop.f32.mrf.mxu0 }
 0x4f7   :  { %v731_v63 = vsel %vm168_vm2, %v730_v61, -inf }
 0x4f8   :  { %732 = vmax.xlane.f32.xlu1 %v731_v63 }
 0x509   :  { %899 = vrot.lane.b32.xlu1 %v2630_v11, %s2558_s19 }
 0x50d   :  { %897 = vrot.lane.b32.xlu1 %v2630_v11, %s2559_s20 }
 0x581   :  { %v733_v0 = vpop.xlane.xlu1 %732 }
 0x582   :  { %v734_v1 = vsub.f32 %v730_v61, %v733_v0  ;;  %v2771_v0 = vld [vmem:[%s2847_s4] ss:$0 sm:$0xff]  ;;  %s2562_s4 = smov [#allocation9]  }
 0x583   :  { %s2146_s25 = sshll.u32 %s2562_s4, 4  ;;  %s2147_s25 = int_to_ptr.vmem [resolvable:$true] %s2146_s25 }
 0x584   :  { %v735_v2 = vmul.f32 1.442695, %v734_v1  ;;  %s2496_s28 = scalar_lea.vmem %s2147_s25, 1024  ;;  %p2501_p2 = scmp.lt.s32.totalorder %s2147_s25, %s2147_s25 }
 0x585   :  { %v900_v14 = vpop.permute.xlu1 %899  ;;  %p2497_p1 = scmp.ne.s32.totalorder %s2147_s25, %s2496_s28  ;;  %p2502_p3 = scmp.lt.s32.totalorder %s2496_s28, %s2496_s28 }
 0x586   :  { %2412 = vpow2.f32 %v735_v2 }
 0x587   :  { %p2503_p4 = por %p2502_p3, %p2501_p2 }
 0x589   :  { %v898_v16 = vpop.permute.xlu1 %897  ;;  %p2504_p5 = pnand %p2503_p4, %p2497_p1 }
 0x593   :  { %v2413_v3 = vpop.eup %2412 }
 0x594   :  { %v737_v4 = vsel %vm168_vm2, %v2413_v3, 0.0 }
 0x595   :  { %738 = vadd.xlane.f32.xlu0 %v737_v4 }
 0x5ab   :  { %747 = vrot.lane.b32.xlu0 %v2630_v11, %s2560_s21 }
 0x61e   :  { %v739_v5 = vpop.xlane.xlu0 %738 }
 0x61f   :  { %2414 = vrcp.f32 %v739_v5 }
 0x622   :  { %v748_v7 = vpop.permute.xlu0 %747 }
 0x623   :  { %2300 = vmatpush3.msra.mxu1 %v748_v7 }
 0x624   :  { %2309 = vmatprep.subr.mxu1 %v2549_v6 }
 0x62c   :  { %v2415_v8 = vpop.eup %2414 }
 0x62d   :  { %v741_v10 = vmul.f32 %v2415_v8, %v739_v5 }
 0x62f   :  { %v742_v12 = vsub.f32 2.0, %v741_v10 }
 0x631   :  { %v743_v13 = vmul.f32 %v2415_v8, %v742_v12 }
 0x633   :  { %v744_v15 = vmul.f32 %v2413_v3, %v743_v13 }
 0x635   :  { %746 = vst.msk [vmem:[#allocation9 + $0x10] sm:$0xff] %vm168_vm2, %v744_v15  ;;  %2302 = vmatmul.mubr.msk.f32.vlgmr.msra.gmra.mxu1 %vm168_vm2, %v744_v15 }
 0x636   :  { %2310 = vmatpush3.xpose.msk.msra.mxu1 %vm168_vm2, %v900_v14  ;;  %2311 = vmatprep.mubr.msk.f32.mxu1 %vm2550_vm1, %v2549_v6 }
 0x637   :  { %2319 = vmatprep.subr.mxu1 %v2549_v6 }
 0x639   :  { %2312 = vmatmul.mubr.msk.f32.vlgmr.msra.gmra.mxu1 %vm168_vm2, %v898_v16 }
 0x63a   :  { %2321 = vmatprep.mubr.msk.f32.mxu1 %vm2550_vm1, %v2549_v6  ;;  %2320 = vmatpush3.msra.mxu1 %v2748_v41 }
 0x63b   :  { %2329 = vmatprep.subr.mxu1 %v2549_v6 }
 0x6f5   :  { %v819_v18 = vpop.f32.mrf.mxu1 }
 0x6f6   :  { %2307 = vmatmul.mubr.msk.f32.vlgmr.msra.gmra.mxu0 %vm168_vm2, %v819_v18 }
 0x6f7   :  { %v2303_v19 = vpop.f32.mrf.mxu1  ;;  %2316 = vmatprep.mubr.msk.f32.mxu0 %vm2550_vm1, %v2549_v6 }
 0x6f9   :  { %v971_v20 = vpop.f32.mrf.mxu1 }
 0x6fa   :  { %v975_v21 = vmul.f32 0.35355338, %v971_v20 }
 0x6fb   :  { %v2313_v22 = vpop.f32.mrf.mxu1 }
 0x6fc   :  { %v976_v23 = vsel %vm168_vm2, %v975_v21, -inf }
 0x6fd   :  { %977 = vmax.xlane.f32.xlu0 %v976_v23 }
 0x713   :  { %992 = vrot.lane.b32.xlu0 %v2630_v11, %s2561_s22 }
 0x717   :  { %1322 = vrot.lane.b32.xlu0 %v2628_v9, %s2553_s15 }
 0x786   :  { %v978_v24 = vpop.xlane.xlu0 %977 }
 0x787   :  { %v979_v25 = vsub.f32 %v975_v21, %v978_v24 }
 0x789   :  { %v980_v26 = vmul.f32 1.442695, %v979_v25 }
 0x78a   :  { %v993_v27 = vpop.permute.xlu0 %992 }
 0x78b   :  { %2416 = vpow2.f32 %v980_v26  ;;  %2315 = vmatpush3.msra.mxu0 %v993_v27 }
 0x78c   :  { %2324 = vmatprep.subr.mxu0 %v2549_v6 }
 0x78e   :  { %v1323_v39 = vpop.permute.xlu0 %1322 }
 0x798   :  { %v2417_v28 = vpop.eup %2416 }
 0x799   :  { %v982_v29 = vsel %vm168_vm2, %v2417_v28, 0.0 }
 0x79a   :  { %983 = vadd.xlane.f32.xlu1 %v982_v29 }
 0x7ab   :  { %1151 = vrot.lane.b32.xlu1 %v2628_v9, %s2552_s14 }
 0x7af   :  { %1320 = vrot.lane.b32.xlu1 %v2628_v9, %s2551_s13 }
 0x7b6   :  { %v892_v11 = vpop.f32.mrf.mxu0 }
 0x7b7   :  { %v2729_v30 = vadd.f32 %v892_v11, %v2690_v58 }
 0x7b8   :  { %v2308_v31 = vpop.f32.mrf.mxu0 }
 0x823   :  { %v984_v32 = vpop.xlane.xlu1 %983 }
 0x824   :  { %2418 = vrcp.f32 %v984_v32 }
 0x827   :  { %v1152_v38 = vpop.permute.xlu1 %1151 }
 0x82b   :  { %v1321_v40 = vpop.permute.xlu1 %1320 }
 0x831   :  { %v2419_v33 = vpop.eup %2418 }
 0x832   :  { %v986_v34 = vmul.f32 %v2419_v33, %v984_v32 }
 0x834   :  { %v987_v35 = vsub.f32 2.0, %v986_v34 }
 0x836   :  { %v988_v36 = vmul.f32 %v2419_v33, %v987_v35 }
 0x838   :  { %v989_v37 = vmul.f32 %v2417_v28, %v988_v36 }
 0x83a   :  { %991 = vst.msk [vmem:[#allocation9 + $0x18] sm:$0xff] %vm168_vm2, %v989_v37  ;;  %2317 = vmatmul.mubr.msk.f32.vlgmr.msra.gmra.mxu0 %vm168_vm2, %v989_v37 }
 0x83b   :  { %2325 = vmatpush3.xpose.msk.msra.mxu0 %vm168_vm2, %v1152_v38  ;;  %2326 = vmatprep.mubr.msk.f32.mxu0 %vm2550_vm1, %v2549_v6 }
 0x83c   :  { %2334 = vmatprep.subr.mxu0 %v2549_v6 }
 0x83e   :  { %2327 = vmatmul.mubr.msk.f32.vlgmr.msra.gmra.mxu0 %vm168_vm2, %v2628_v9 }
 0x83f   :  { %2335 = vmatpush3.xpose.msk.msra.mxu0 %vm168_vm2, %v1323_v39  ;;  %2336 = vmatprep.mubr.msk.f32.mxu0 %vm2550_vm1, %v2549_v6 }
 0x840   :  { %2344 = vmatprep.subr.mxu0 %v2549_v6 }
 0x842   :  { %2337 = vmatmul.mubr.msk.f32.vlgmr.msra.gmra.mxu0 %vm168_vm2, %v1321_v40 }
 0x843   :  { %2345 = vmatpush3.msra.mxu0 %v2674_v48  ;;  %2346 = vmatprep.mubr.msk.f32.mxu0 %vm2550_vm1, %v2549_v6 }
 0x844   :  { %2354 = vmatprep.subr.mxu0 %v2549_v6 }
 0x8fa   :  { %v1064_v42 = vpop.f32.mrf.mxu0 }
 0x8fb   :  { %2322 = vmatmul.mubr.msk.f32.vlgmr.msra.gmra.mxu1 %vm168_vm2, %v1064_v42 }
 0x8fc   :  { %v2318_v43 = vpop.f32.mrf.mxu0  ;;  %2331 = vmatprep.mubr.msk.f32.mxu1 %vm2550_vm1, %v2549_v6 }
 0x8fe   :  { %v1223_v44 = vpop.f32.mrf.mxu0 }
 0x8ff   :  { %v1227_v45 = vmul.f32 0.35355338, %v1223_v44 }
 0x900   :  { %v2328_v46 = vpop.f32.mrf.mxu0 }
 0x901   :  { %v1228_v48 = vsel %vm168_vm2, %v1227_v45, -inf }
 0x902   :  { %1229 = vmax.xlane.f32.xlu0 %v1228_v48  ;;  %v1394_v49 = vpop.f32.mrf.mxu0 }
 0x903   :  { %v1398_v50 = vmul.f32 0.35355338, %v1394_v49 }
 0x904   :  { %v2338_v51 = vpop.f32.mrf.mxu0 }
 0x905   :  { %v1399_v52 = vsel %vm168_vm2, %v1398_v50, -inf }
 0x906   :  { %1400 = vmax.xlane.f32.xlu1 %v1399_v52 }
 0x917   :  { %1244 = vrot.lane.b32.xlu1 %v2628_v9, %s2555_s16 }
 0x91b   :  { %1639 = vrot.lane.b32.xlu1 %v2628_v9, %s2556_s17 }
 0x91f   :  { %1637 = vrot.lane.b32.xlu1 %v2628_v9, %s2557_s18 }
 0x98b   :  { %v1230_v53 = vpop.xlane.xlu0 %1229 }
 0x98c   :  { %v1231_v54 = vsub.f32 %v1227_v45, %v1230_v53 }
 0x98e   :  { %v1232_v55 = vmul.f32 1.442695, %v1231_v54 }
 0x98f   :  { %v1401_v56 = vpop.xlane.xlu1 %1400 }
 0x990   :  { %2420 = vpow2.f32 %v1232_v55  ;;  %v1402_v57 = vsub.f32 %v1398_v50, %v1401_v56 }
 0x992   :  { %v1403_v58 = vmul.f32 1.442695, %v1402_v57 }
 0x993   :  { %v1245_v59 = vpop.permute.xlu1 %1244 }
 0x994   :  { %2422 = vpow2.f32 %v1403_v58  ;;  %2330 = vmatpush3.msra.mxu1 %v1245_v59 }
 0x995   :  { %2339 = vmatprep.subr.mxu1 %v2549_v6 }
 0x997   :  { %v1640_v23 = vpop.permute.xlu1 %1639 }
 0x99d   :  { %v2421_v60 = vpop.eup %2420 }
 0x99e   :  { %v1234_v61 = vsel %vm168_vm2, %v2421_v60, 0.0 }
 0x99f   :  { %1235 = vadd.xlane.f32.xlu0 %v1234_v61 }
 0x9a1   :  { %v2423_v62 = vpop.eup %2422 }
 0x9a2   :  { %v1405_v63 = vsel %vm168_vm2, %v2423_v62, 0.0 }
 0x9a3   :  { %1406 = vadd.xlane.f32.xlu0 %v1405_v63 }
 0x9b9   :  { %1415 = vrot.lane.b32.xlu0 %v2628_v9, %s2554_s2 }
 0x9bb   :  { %v1137_v1 = vpop.f32.mrf.mxu1 }
 0x9bc   :  { %v1141_v2 = vadd.f32 %v1137_v1, %v2729_v30 }
 0x9bd   :  { %v2323_v3 = vpop.f32.mrf.mxu1 }
 0x9be   :  { %v1148_v4 = vadd.f32 %v2771_v0, %v1141_v2 }
 0x9c0   :  { %1149 = vst.msk [vmem:[#allocation8] sm:$0xff] %vm78_vm0, %v1148_v4 }
 0xa28   :  { %v1236_v5 = vpop.xlane.xlu0 %1235 }
 0xa29   :  { %2424 = vrcp.f32 %v1236_v5 }
 0xa2c   :  { %v1407_v7 = vpop.xlane.xlu0 %1406 }
 0xa2d   :  { %2426 = vrcp.f32 %v1407_v7 }
 0xa30   :  { %v1416_v20 = vpop.permute.xlu0 %1415 }
 0xa36   :  { %v2425_v8 = vpop.eup %2424 }
 0xa37   :  { %v1238_v10 = vmul.f32 %v2425_v8, %v1236_v5 }
 0xa39   :  { %v1239_v12 = vsub.f32 2.0, %v1238_v10 }
 0xa3a   :  { %v2427_v13 = vpop.eup %2426 }
 0xa3b   :  { %v1240_v14 = vmul.f32 %v2425_v8, %v1239_v12  ;;  %v1409_v15 = vmul.f32 %v2427_v13, %v1407_v7 }
 0xa3d   :  { %v1241_v16 = vmul.f32 %v2421_v60, %v1240_v14  ;;  %v1410_v18 = vsub.f32 2.0, %v1409_v15 }
 0xa3f   :  { %1243 = vst.msk [vmem:[#allocation9 + $0x20] sm:$0xff] %vm168_vm2, %v1241_v16  ;;  %v1411_v19 = vmul.f32 %v2427_v13, %v1410_v18  ;;  %2332 = vmatmul.mubr.msk.f32.vlgmr.msra.gmra.mxu1 %vm168_vm2, %v1241_v16 }
 0xa40   :  { %2340 = vmatpush3.msra.mxu1 %v1416_v20  ;;  %2341 = vmatprep.mubr.msk.f32.mxu1 %vm2550_vm1, %v2549_v6 }
 0xa41   :  { %v1412_v21 = vmul.f32 %v2423_v62, %v1411_v19  ;;  %2349 = vmatprep.subr.mxu1 %v2549_v6 }
 0xa43   :  { %1414 = vst.msk [vmem:[#allocation9 + $0x28] sm:$0xff] %vm168_vm2, %v1412_v21  ;;  %2342 = vmatmul.mubr.msk.f32.vlgmr.msra.gmra.mxu1 %vm168_vm2, %v1412_v21 }
 0xa44   :  { %2350 = vmatpush3.msra.mxu1 %v2671_v47  ;;  %2351 = vmatprep.mubr.msk.f32.mxu1 %vm2550_vm1, %v2549_v6  ;;  %v1638_v47 = vpop.permute.xlu1 %1637 }
 0xa45   :  { %2359 = vmatprep.subr.mxu1 %v2549_v6 }
 0xaff   :  { %v1316_v22 = vpop.f32.mrf.mxu1 }
 0xb00   :  { %2352 = vmatmul.mubr.msk.f32.vlgmr.msra.gmra.mxu1 %vm168_vm2, %v1316_v22 }
 0xb01   :  { %v2333_v24 = vpop.f32.mrf.mxu1  ;;  %2361 = vmatprep.mubr.msk.f32.mxu1 %vm2550_vm1, %v2549_v6 }
 0xb03   :  { %v1487_v25 = vpop.f32.mrf.mxu1 }
 0xb04   :  { %2347 = vmatmul.mubr.msk.f32.vlgmr.msra.gmra.mxu0 %vm168_vm2, %v1487_v25 }
 0xb05   :  { %2355 = vmatpush3.xpose.msk.msra.mxu0 %vm168_vm2, %v1640_v23  ;;  %v2343_v26 = vpop.f32.mrf.mxu1  ;;  %2356 = vmatprep.mubr.msk.f32.mxu0 %vm2550_vm1, %v2549_v6 }
 0xb06   :  { %2364 = vmatprep.subr.mxu0 %v2549_v6 }
 0xb08   :  { %2357 = vmatmul.mubr.msk.f32.vlgmr.msra.gmra.mxu0 %vm168_vm2, %v1638_v47 }
 0xb09   :  { %2365 = vmatpush3.msra.mxu0 %v2710_v17  ;;  %2366 = vmatprep.mubr.msk.f32.mxu0 %vm2550_vm1, %v2549_v6 }
 0xb0a   :  { %2374 = vmatprep.subr.mxu0 %v2549_v6 }
 0xbc0   :  { %v1633_v27 = vpop.f32.mrf.mxu1 }
 0xbc2   :  { %v2353_v28 = vpop.f32.mrf.mxu1 }
 0xbc4   :  { %v1560_v29 = vpop.f32.mrf.mxu0 }
 0xbc5   :  { %v1634_v11 = vadd.f32 %v1633_v27, %v1560_v29 }
 0xbc6   :  { %v2348_v30 = vpop.f32.mrf.mxu0 }
 0xbc8   :  { %v1711_v31 = vpop.f32.mrf.mxu0 }
 0xbc9   :  { %v1715_v32 = vmul.f32 0.35355338, %v1711_v31 }
 0xbca   :  { %v2358_v33 = vpop.f32.mrf.mxu0 }
 0xbcb   :  { %v1716_v34 = vsel %vm168_vm2, %v1715_v32, -inf }
 0xbcc   :  { %1717 = vmax.xlane.f32.xlu0 %v1716_v34 }
 0xbe2   :  { %1732 = vrot.lane.b32.xlu0 %v2628_v9, %s2560_s21 }
 0xbe6   :  { %1882 = vrot.lane.b32.xlu0 %v2628_v9, %s2559_s20 }
 0xc55   :  { %v1718_v17 = vpop.xlane.xlu0 %1717 }
 0xc56   :  { %v1719_v35 = vsub.f32 %v1715_v32, %v1718_v17 }
 0xc58   :  { %v1720_v36 = vmul.f32 1.442695, %v1719_v35 }
 0xc59   :  { %v1733_v37 = vpop.permute.xlu0 %1732 }
 0xc5a   :  { %2428 = vpow2.f32 %v1720_v36  ;;  %2360 = vmatpush3.msra.mxu1 %v1733_v37 }
 0xc5b   :  { %2369 = vmatprep.subr.mxu1 %v2549_v6 }
 0xc5d   :  { %v1883_v49 = vpop.permute.xlu0 %1882 }
 0xc67   :  { %v2429_v38 = vpop.eup %2428 }
 0xc68   :  { %v1722_v39 = vsel %vm168_vm2, %v2429_v38, 0.0 }
 0xc69   :  { %1723 = vadd.xlane.f32.xlu1 %v1722_v39 }
 0xc7a   :  { %1884 = vrot.lane.b32.xlu1 %v2628_v9, %s2558_s19 }
 0xcf2   :  { %v1724_v40 = vpop.xlane.xlu1 %1723 }
 0xcf3   :  { %2430 = vrcp.f32 %v1724_v40 }
 0xcf6   :  { %v1885_v48 = vpop.permute.xlu1 %1884 }
 0xd00   :  { %v2431_v42 = vpop.eup %2430 }
 0xd01   :  { %v1726_v43 = vmul.f32 %v2431_v42, %v1724_v40 }
 0xd03   :  { %v1727_v44 = vsub.f32 2.0, %v1726_v43 }
 0xd05   :  { %v1728_v45 = vmul.f32 %v2431_v42, %v1727_v44 }
 0xd07   :  { %v1729_v46 = vmul.f32 %v2429_v38, %v1728_v45 }
 0xd09   :  { %1731 = vst.msk [vmem:[#allocation9 + $0x30] sm:$0xff] %vm168_vm2, %v1729_v46  ;;  %2362 = vmatmul.mubr.msk.f32.vlgmr.msra.gmra.mxu1 %vm168_vm2, %v1729_v46 }
 0xd0a   :  { %2370 = vmatpush3.xpose.msk.msra.mxu1 %vm168_vm2, %v1885_v48  ;;  %2371 = vmatprep.mubr.msk.f32.mxu1 %vm2550_vm1, %v2549_v6 }
 0xd0b   :  { %2379 = vmatprep.subr.mxu1 %v2549_v6 }
 0xd0d   :  { %2372 = vmatmul.mubr.msk.f32.vlgmr.msra.gmra.mxu1 %vm168_vm2, %v1883_v49 }
 0xd0e   :  { %2380 = vmatpush3.msra.mxu1 %v2748_v41  ;;  %2381 = vmatprep.mubr.msk.f32.mxu1 %vm2550_vm1, %v2549_v6 }
 0xdc9   :  { %v1804_v50 = vpop.f32.mrf.mxu1 }
 0xdca   :  { %2367 = vmatmul.mubr.msk.f32.vlgmr.msra.gmra.mxu0 %vm168_vm2, %v1804_v50 }
 0xdcb   :  { %v2363_v51 = vpop.f32.mrf.mxu1  ;;  %2376 = vmatprep.mubr.msk.f32.mxu0 %vm2550_vm1, %v2549_v6 }
 0xdcd   :  { %v1956_v52 = vpop.f32.mrf.mxu1 }
 0xdce   :  { %v1960_v53 = vmul.f32 0.35355338, %v1956_v52 }
 0xdcf   :  { %v2373_v54 = vpop.f32.mrf.mxu1 }
 0xdd0   :  { %v1961_v55 = vsel %vm168_vm2, %v1960_v53, -inf }
 0xdd1   :  { %1962 = vmax.xlane.f32.xlu1 %v1961_v55 }
 0xe5a   :  { %v1963_v56 = vpop.xlane.xlu1 %1962 }
 0xe5b   :  { %v1964_v57 = vsub.f32 %v1960_v53, %v1963_v56 }
 0xe5d   :  { %v1965_v58 = vmul.f32 1.442695, %v1964_v57 }
 0xe5f   :  { %2432 = vpow2.f32 %v1965_v58 }
 0xe6c   :  { %v2433_v41 = vpop.eup %2432 }
 0xe6d   :  { %v1967_v59 = vsel %vm168_vm2, %v2433_v41, 0.0 }
 0xe6e   :  { %1968 = vadd.xlane.f32.xlu0 %v1967_v59 }
 0xe84   :  { %1977 = vrot.lane.b32.xlu0 %v2628_v9, %s2561_s22 }
 0xe8a   :  { %v1877_v60 = vpop.f32.mrf.mxu0 }
 0xe8b   :  { %v1881_v61 = vadd.f32 %v1877_v60, %v1634_v11 }
 0xe8c   :  { %v2368_v6 = vpop.f32.mrf.mxu0 }
 0xef7   :  { %v1969_v62 = vpop.xlane.xlu0 %1968 }
 0xef8   :  { %2434 = vrcp.f32 %v1969_v62 }
 0xefb   :  { %v1978_v63 = vpop.permute.xlu0 %1977 }
 0xefc   :  { %2375 = vmatpush3.msra.mxu0 %v1978_v63 }
 0xf05   :  { %v2435_v1 = vpop.eup %2434 }
 0xf06   :  { %v1971_v2 = vmul.f32 %v2435_v1, %v1969_v62 }
 0xf08   :  { %v1972_v3 = vsub.f32 2.0, %v1971_v2 }
 0xf0a   :  { %v1973_v4 = vmul.f32 %v2435_v1, %v1972_v3 }
 0xf0c   :  { %v1974_v5 = vmul.f32 %v2433_v41, %v1973_v4 }
 0xf0e   :  { %1976 = vst.msk [vmem:[#allocation9 + $0x38] sm:$0xff] %vm168_vm2, %v1974_v5  ;;  %2377 = vmatmul.mubr.msk.f32.vlgmr.msra.gmra.mxu0 %vm168_vm2, %v1974_v5 }
 0xfce   :  { %v2049_v7 = vpop.f32.mrf.mxu0 }
 0xfcf   :  { %2382 = vmatmul.mubr.msk.f32.vlgmr.msra.gmra.mxu1 %vm168_vm2, %v2049_v7 }
 0xfd0   :  { %v2378_v9 = vpop.f32.mrf.mxu0 }
 0xfd1   :  { %2507 = shalt.err (!%p2504_p5)
}
 0xfd2   :  { %2152 = dma.vmem_to_hbm [thread:$0]  %s2147_s25, 1024, %s2849_s6, [#allocation10], %s2546_s26, %s2546_s26, %s2547_s27  }
 0xfd3   :  { %s2563_s7 = smov [#allocation8]  }
 0xfd4   :  { %s2134_s8 = sshll.u32 %s2563_s7, 4  ;;  %s2135_s8 = int_to_ptr.vmem [resolvable:$true] %s2134_s8 }
 0xfd5   :  { %s2516_s9 = scalar_lea.vmem %s2135_s8, 256  ;;  %p2521_p7 = scmp.lt.s32.totalorder %s2135_s8, %s2135_s8 }
 0xfd6   :  { %p2517_p6 = scmp.ne.s32.totalorder %s2135_s8, %s2516_s9  ;;  %p2522_p8 = scmp.lt.s32.totalorder %s2516_s9, %s2516_s9 }
 0xfd8   :  { %p2523_p9 = por %p2522_p8, %p2521_p7 }
 0xfda   :  { %p2524_p10 = pnand %p2523_p9, %p2517_p6 }
0x108f   :  { %v2122_v8 = vpop.f32.mrf.mxu1 }
0x1090   :  { %v2126_v10 = vadd.f32 %v2122_v8, %v1881_v61 }
0x1091   :  { %v2383_v12 = vpop.f32.mrf.mxu1 }
0x1092   :  { %v2127_v13 = vadd.f32 %v2771_v0, %v2126_v10 }
0x1094   :  { %2128 = vst.msk [vmem:[#allocation8 + $0x8] sm:$0xff] %vm78_vm0, %v2127_v13 }
0x1095   :  { %2527 = shalt.err (!%p2524_p10)
}
0x1096   :  { %2140 = dma.vmem_to_hbm [thread:$0]  %s2135_s8, 256, %s2848_s5, [#allocation4], %s2546_s26, %s2546_s26, %s2547_s27  }
0x1097   :  { %2540 = dma.done.wait [#allocation4], 256  }
0x1098   :  { %2541 = vsyncadd [#allocation4], 4294967040 }
0x1099   :  { %2542 = dma.done.wait [#allocation10], 1024  }
0x109a   :  { %2543 = vsyncadd [#allocation10], 4294966272 }
0x109b   :  { %2159 = vsyncpa [#allocation3], 1 }
0x109c   :  { %2160 = vsyncpa [#allocation6], 1 }
0x109d   :  { %2161 = vsyncpa [#allocation4], 1 }
0x109e   :  { %2162 = vsyncpa [#allocation10], 1 }

</bundles_post_ra>
